<compile_context>
chip_gen: v7x
topology: tpu7x:2x2x1
jax: 0.10.0
libtpu: 0.0.40
codegen_flags: <defaults>
</compile_context>

<pallas_src>
import jax
import jax.numpy as jnp
from jax.experimental import pallas as pl
from jax.experimental.pallas import tpu as pltpu


def _self_attention_kernel(hidden_ref, mask_ref, wa_ref, wbt_ref, out_ref):
    # hidden_ref: [TB, E, D]   mask_ref: [TB, E]
    # wa_ref:     [D, H]       wbt_ref:  [1, H]   (Wb transposed, lane-dense)
    # out_ref:    [TB, D]
    TB, E, D = hidden_ref.shape
    H = wa_ref.shape[1]

    h = hidden_ref[...]                      # [TB, E, D]
    h2 = h.reshape(TB * E, D)                # fuse all TB batches into one matmul

    # hidden @ Wa on the MXU (f32 accumulate), tanh on the EUP.
    t = jnp.tanh(jnp.dot(h2, wa_ref[...], preferred_element_type=jnp.float32))  # [TB*E, H]

    # score = t @ Wb is an N=1 matmul -> keep it off the MXU: VPU mul + lane reduce.
    aw = jnp.sum((t * wbt_ref[...]).reshape(TB, E, H), axis=-1)                  # [TB, E]

    # Mask + normalize (matches the PyTorch module exactly, incl. the +1e-30;
    # this is a signed-sum normalization, not a softmax).
    aw = aw * mask_ref[...]
    denom = jnp.sum(aw, axis=-1, keepdims=True) + 1e-30
    aw = aw / denom                                                              # [TB, E]

    # Weighted sum over entities is an M=1 matmul per batch -> VPU/XLU instead.
    out_ref[...] = jnp.sum(aw[:, :, None] * h.astype(jnp.float32), axis=1).astype(out_ref.dtype)


def _pick_block_b(B, E):
    """Pick a batch tile TB so TB*E rows feed the MXU (~256-row target)."""
    tb = max(1, 256 // max(E, 1))
    if B <= tb:
        # Single grid step: block shapes equal the full array dims (always legal).
        return B
    # Multi-step: keep TB a multiple of 8 so (TB, D) output / (TB, E) mask blocks
    # are sublane-dense; guarantees >=2 grid steps (v7x has 2 TensorCores).
    return max(8, (tb // 8) * 8)


def self_attention_forward(hidden, mask, Wa, Wb, *, block_b=None,
                           compute_dtype=jnp.float32):
    """hidden: [B, E, D], mask: [B, E] (0/1), Wa: [D, H], Wb: [H, 1] -> [B, D] f32.

    compute_dtype=jnp.bfloat16 halves HBM traffic for hidden/Wa on v6e/v7x
    (MXU is bf16-native); keep jnp.float32 for bit-tight parity with the f32 ref.
    """
    B, E, D = hidden.shape
    H = Wa.shape[1]

    tb = _pick_block_b(B, E) if block_b is None else block_b

    # Pad the batch so it tiles evenly.  Padded rows have hidden=0 and mask=0,
    # which yields a 0 output row (0 / 1e-30); they are sliced off below.
    B_pad = pl.cdiv(B, tb) * tb
    if B_pad != B:
        hidden = jnp.pad(hidden, ((0, B_pad - B), (0, 0), (0, 0)))
        mask = jnp.pad(mask, ((0, B_pad - B), (0, 0)))

    hidden_c = hidden.astype(compute_dtype)
    wa_c = Wa.astype(compute_dtype)
    wbt = Wb.reshape(1, H).astype(jnp.float32)     # lane-dense transposed Wb
    mask_f = mask.astype(jnp.float32)

    out = pl.pallas_call(
        _self_attention_kernel,
        out_shape=jax.ShapeDtypeStruct((B_pad, D), jnp.float32),
        grid_spec=pltpu.PrefetchScalarGridSpec(
            num_scalar_prefetch=0,
            grid=(B_pad // tb,),
            in_specs=[
                pl.BlockSpec((tb, E, D), lambda b: (b, 0, 0)),   # hidden: TB batches/step
                pl.BlockSpec((tb, E), lambda b: (b, 0)),         # mask
                pl.BlockSpec((D, H), lambda b: (0, 0)),          # Wa: grid-invariant/resident
                pl.BlockSpec((1, H), lambda b: (0, 0)),          # Wb^T: resident, lane-dense
            ],
            out_specs=pl.BlockSpec((tb, D), lambda b: (b, 0)),   # lane/sublane-dense output slab
        ),
        compiler_params=pltpu.CompilerParams(
            dimension_semantics=("parallel",),
        ),
    )(hidden_c, mask_f, wa_c, wbt)
    return out[:B]


def _xavier_uniform(key, shape, gain):
    fan_in, fan_out = shape[0], shape[1]
    bound = gain * jnp.sqrt(6.0 / (fan_in + fan_out))
    return jax.random.uniform(key, shape, jnp.float32, minval=-bound, maxval=bound)


def _reference(hidden, mask, Wa, Wb):
    # Pure-JAX reference mirroring the PyTorch forward.
    aw = jnp.matmul(jnp.tanh(jnp.matmul(hidden, Wa)), Wb)[..., 0]   # [B, E]
    aw = aw * mask.astype(jnp.float32)
    aw = aw / (jnp.sum(aw, -1, keepdims=True) + 1e-30)
    return jnp.sum(aw[..., None] * hidden, axis=1)                  # [B, D]


if __name__ == "__main__":
    # Small shapes consistent with the module: B=2 batches, E=8 entities,
    # embedding_dim=32, hidden_size=32.
    B, E, D, H = 2, 8, 32, 32
    key = jax.random.PRNGKey(0)
    k_h, k_m, k_wa, k_wb = jax.random.split(key, 4)

    hidden = jax.random.normal(k_h, (B, E, D), jnp.float32)
    mask = (jax.random.uniform(k_m, (B, E)) > 0.3).astype(jnp.float32)

    gain = 1.414  # matches nn.init.xavier_uniform_(..., gain=1.414)
    Wa = _xavier_uniform(k_wa, (D, H), gain)
    Wb = _xavier_uniform(k_wb, (H, 1), gain)

    out = self_attention_forward(hidden, mask, Wa, Wb)
    out = jax.block_until_ready(out)
    ref = _reference(hidden, mask, Wa, Wb)
    assert out.shape == (B, D)
    assert jnp.allclose(out, ref, atol=1e-5, rtol=1e-5), "mismatch vs reference"

    # Exercise the batched-blocking + padding path (B not a multiple of TB=32):
    # grid has multiple steps, each step does one [TB*E, D] @ [D, H] matmul.
    B2 = 80
    k_h2, k_m2 = jax.random.split(jax.random.PRNGKey(1))
    hidden2 = jax.random.normal(k_h2, (B2, E, D), jnp.float32)
    mask2 = (jax.random.uniform(k_m2, (B2, E)) > 0.3).astype(jnp.float32)
    out2 = jax.block_until_ready(self_attention_forward(hidden2, mask2, Wa, Wb))
    ref2 = _reference(hidden2, mask2, Wa, Wb)
    assert out2.shape == (B2, D)
    # Scale-aware check: the module's signed-sum normalization can produce large
    # magnitudes when the masked score sum is small, so compare normalized error.
    err = jnp.max(jnp.abs(out2 - ref2)) / (jnp.max(jnp.abs(ref2)) + 1e-6)
    assert err < 5e-2, f"normalized mismatch vs reference: {err}"

    print("KERNEL_OK")
</pallas_src>

<mosaic_0001>
module attributes {stable_mosaic.version = 11 : i64} {
  func.func @_self_attention_kernel(%arg0: i32, %arg1: memref<2x8x32xf32, #tpu.memory_space<vmem>>, %arg2: memref<2x8xf32, #tpu.memory_space<vmem>>, %arg3: memref<32x32xf32, #tpu.memory_space<vmem>>, %arg4: memref<1x32xf32, #tpu.memory_space<vmem>>, %arg5: memref<2x32xf32, #tpu.memory_space<vmem>>) attributes {dimension_semantics = [#tpu.dimension_semantics<parallel>], iteration_bounds = array<i64: 1>, scalar_prefetch = 0 : i64, scratch_operands = 0 : i64, tpu.core_type = #tpu.core_type<tc>, window_params = [{transform_indices = @transform_0, window_bounds = array<i64: 2, 8, 32>}, {transform_indices = @transform_1, window_bounds = array<i64: 2, 8>}, {pipeline_mode = #tpu.pipeline_mode<synchronous>, transform_indices = @transform_2, window_bounds = array<i64: 32, 32>}, {pipeline_mode = #tpu.pipeline_mode<synchronous>, transform_indices = @transform_3, window_bounds = array<i64: 1, 32>}, {transform_indices = @transform_4, window_bounds = array<i64: 2, 32>}]} {
    %c0 = arith.constant 0 : index
    %c0_0 = arith.constant 0 : index
    %c0_1 = arith.constant 0 : index
    %0 = vector.load %arg1[%c0, %c0_0, %c0_1] : memref<2x8x32xf32, #tpu.memory_space<vmem>>, vector<2x8x32xf32>
    %1 = vector.shape_cast %0 : vector<2x8x32xf32> to vector<16x32xf32>
    %c0_2 = arith.constant 0 : index
    %c0_3 = arith.constant 0 : index
    %2 = vector.load %arg3[%c0_2, %c0_3] : memref<32x32xf32, #tpu.memory_space<vmem>>, vector<32x32xf32>
    %cst = arith.constant dense<0.000000e+00> : vector<16x32xf32>
    %3 = tpu.matmul %1, %2, %cst {dimension_numbers = #tpu.dot_dimension_numbers<[1], [0], [0], [1], [0, 0, 1, 1], [], []>} : vector<16x32xf32>, vector<32x32xf32>, vector<16x32xf32> -> vector<16x32xf32>
    %4 = math.tanh %3 : vector<16x32xf32>
    %c0_4 = arith.constant 0 : index
    %c0_5 = arith.constant 0 : index
    %5 = vector.load %arg4[%c0_4, %c0_5] : memref<1x32xf32, #tpu.memory_space<vmem>>, vector<1x32xf32>
    %6 = vector.broadcast %5 : vector<1x32xf32> to vector<16x32xf32>
    %7 = arith.mulf %4, %6 : vector<16x32xf32>
    %8 = vector.shape_cast %7 : vector<16x32xf32> to vector<2x8x32xf32>
    %cst_6 = arith.constant dense<0.000000e+00> : vector<2x8xf32>
    %9 = vector.multi_reduction <add>, %8, %cst_6 [2] : vector<2x8x32xf32> to vector<2x8xf32>
    %c0_7 = arith.constant 0 : index
    %c0_8 = arith.constant 0 : index
    %10 = vector.load %arg2[%c0_7, %c0_8] : memref<2x8xf32, #tpu.memory_space<vmem>>, vector<2x8xf32>
    %11 = arith.mulf %9, %10 : vector<2x8xf32>
    %cst_9 = arith.constant dense<0.000000e+00> : vector<2xf32>
    %12 = vector.multi_reduction <add>, %11, %cst_9 [1] : vector<2x8xf32> to vector<2xf32>
    %13 = vector.shape_cast %12 : vector<2xf32> to vector<2x1xf32>
    %cst_10 = arith.constant 1.000000e-30 : f32
    %14 = vector.broadcast %cst_10 : f32 to vector<2x1xf32>
    %15 = arith.addf %13, %14 : vector<2x1xf32>
    %16 = vector.broadcast %15 : vector<2x1xf32> to vector<2x8xf32>
    %17 = arith.divf %11, %16 : vector<2x8xf32>
    %18 = vector.shape_cast %17 : vector<2x8xf32> to vector<2x8x1xf32>
    %19 = vector.broadcast %18 : vector<2x8x1xf32> to vector<2x8x32xf32>
    %20 = arith.mulf %19, %0 : vector<2x8x32xf32>
    %cst_11 = arith.constant dense<0.000000e+00> : vector<2x32xf32>
    %21 = vector.multi_reduction <add>, %20, %cst_11 [1] : vector<2x8x32xf32> to vector<2x32xf32>
    %c0_12 = arith.constant 0 : index
    %c0_13 = arith.constant 0 : index
    %22 = vector.load %arg5[%c0_12, %c0_13] : memref<2x32xf32, #tpu.memory_space<vmem>>, vector<2x32xf32>
    tpu.vector_store %arg5[%c0_12, %c0_13], %21 {strides = array<i32>} : memref<2x32xf32, #tpu.memory_space<vmem>>, vector<2x32xf32>,
    return
  }
  func.func @transform_0(%arg0: i32) -> (i32, i32, i32) {
    %c0_i32 = arith.constant 0 : i32
    %c0_i32_0 = arith.constant 0 : i32
    %c0_i32_1 = arith.constant 0 : i32
    return %arg0, %c0_i32, %c0_i32_0 : i32, i32, i32
  }
  func.func @transform_1(%arg0: i32) -> (i32, i32) {
    %c0_i32 = arith.constant 0 : i32
    %c0_i32_0 = arith.constant 0 : i32
    return %arg0, %c0_i32 : i32, i32
  }
  func.func @transform_2(%arg0: i32) -> (i32, i32) {
    %c0_i32 = arith.constant 0 : i32
    %c0_i32_0 = arith.constant 0 : i32
    %c0_i32_1 = arith.constant 0 : i32
    return %c0_i32, %c0_i32_0 : i32, i32
  }
  func.func @transform_3(%arg0: i32) -> (i32, i32) {
    %c0_i32 = arith.constant 0 : i32
    %c0_i32_0 = arith.constant 0 : i32
    %c0_i32_1 = arith.constant 0 : i32
    return %c0_i32, %c0_i32_0 : i32, i32
  }
  func.func @transform_4(%arg0: i32) -> (i32, i32) {
    %c0_i32 = arith.constant 0 : i32
    %c0_i32_0 = arith.constant 0 : i32
    return %arg0, %c0_i32 : i32, i32
  }
}

</mosaic_0001>

<bundles_post_ra>
// kernel: tpu_custom_call.1
= control target key start
LH: loop header
LB: loop body
LE: loop exit
PB: predicated region body
PF: predicated region fallthrough
CT: control target
= control target key end

     0   :  { %9 = vsyncpa [#allocation3], 0  ;;  %s461_s0 = inlined_call_operand.hbm [shape: f32[2,8,32], index: 0, kind: input, shape index: {}]   ;;  %s462_s1 = inlined_call_operand.vmem [shape: f32[2,8], index: 1, kind: input, shape index: {}]   ;;  %s463_s2 = inlined_call_operand.hbm [shape: f32[32,32], index: 2, kind: input, shape index: {}]   ;;  %s464_s3 = inlined_call_operand.vmem [shape: f32[1,32], index: 3, kind: input, shape index: {}]   ;;  %s465_s4 = inlined_call_operand.hbm [shape: f32[2,32], index: 4, kind: output, shape index: {}]  }
   0x1   :  { %10 = vsyncpa [#allocation6], 0 }
   0x2   :  { %11 = vsyncpa [#allocation4], 0  ;;  %s376_s15 = smov [#allocation2]   ;;  %s304_s19 = scalar_lea.hbm %s461_s0, 256 }
   0x3   :  { %s17_s16 = sshll.u32 %s376_s15, 4  ;;  %p305_p0 = scmp.ne.s32.totalorder %s461_s0, %s304_s19  ;;  %s18_s16 = int_to_ptr.vmem [resolvable:$true] %s17_s16 }
   0x4   :  { %p308_p1 = scmp.lt.u32.totalorder %s304_s19, %s461_s0 }
   0x6   :  { %p310_p2 = pnand %p308_p1, %p305_p0 }
   0x8   :  { %313 = shalt.err (!%p310_p2)
}
   0x9   :  { %s314_s24 = scalar_lea.vmem %s18_s16, 256  ;;  %p319_p4 = scmp.lt.s32.totalorder %s18_s16, %s18_s16 }
   0xa   :  { %p315_p3 = scmp.ne.s32.totalorder %s18_s16, %s314_s24  ;;  %p320_p5 = scmp.lt.s32.totalorder %s314_s24, %s314_s24 }
   0xc   :  { %p321_p6 = por %p320_p5, %p319_p4 }
   0xe   :  { %p322_p7 = pnand %p321_p6, %p315_p3 }
  0x10   :  { %325 = shalt.err (!%p322_p7)
}
  0x11   :  { %s377_s25 = smov 128   ;;  %s378_s26 = smov 8  }
  0x12   :  { %23 = dma.hbm_to_vmem [thread:$0]  %s461_s0, 256, %s18_s16, [#allocation3], %s377_s25, %s377_s25, %s378_s26  }
  0x13   :  { %s379_s29 = smov [#allocation5]   ;;  %s326_s7 = scalar_lea.hbm %s463_s2, 512 }
  0x14   :  { %s31_s30 = sshll.u32 %s379_s29, 4  ;;  %p327_p8 = scmp.ne.s32.totalorder %s463_s2, %s326_s7  ;;  %s32_s30 = int_to_ptr.vmem [resolvable:$true] %s31_s30 }
  0x15   :  { %p330_p9 = scmp.lt.u32.totalorder %s326_s7, %s463_s2 }
  0x17   :  { %p332_p10 = pnand %p330_p9, %p327_p8 }
  0x19   :  { %335 = shalt.err (!%p332_p10)
}
  0x1a   :  { %s336_s12 = scalar_lea.vmem %s32_s30, 512  ;;  %p341_p12 = scmp.lt.s32.totalorder %s32_s30, %s32_s30 }
  0x1b   :  { %p337_p11 = scmp.ne.s32.totalorder %s32_s30, %s336_s12  ;;  %p342_p13 = scmp.lt.s32.totalorder %s336_s12, %s336_s12 }
  0x1d   :  { %p343_p0 = por %p342_p13, %p341_p12 }
  0x1f   :  { %p344_p1 = pnand %p343_p0, %p337_p11 }
  0x21   :  { %347 = shalt.err (!%p344_p1)
}
  0x22   :  { %37 = dma.hbm_to_vmem [thread:$0]  %s463_s2, 512, %s32_s30, [#allocation6], %s377_s25, %s377_s25, %s378_s26  }
  0x23   :  { %370 = dma.done.wait [#allocation3], 256  }
  0x24   :  { %371 = vsyncadd [#allocation3], 4294967040 }
  0x25   :  { %372 = dma.done.wait [#allocation6], 512  }
  0x26   :  { %373 = vsyncadd [#allocation6], 4294966784  ;;  %vm52_vm0 = vcmask 261120   ;;  %v48_v0 = vld [vmem:[#allocation5] sm:$0xff]  ;;  %v49_v1 = vld [vmem:[#allocation5 + $0x8] sm:$0xff]  ;;  %v153_v8 = vlaneseq  ;;  %v380_v24 = vmov 0  }
  0x27   :  { %v50_v2 = vld [vmem:[#allocation5 + $0x10] sm:$0xff]  ;;  %v280_v3 = vpack.c.bf16 %v49_v1, %v48_v0  ;;  %v51_v4 = vld [vmem:[#allocation5 + $0x18] sm:$0xff]  ;;  %294 = vset.pattern.permute.xlu0 %v380_v24  ;;  %295 = vset.pattern.permute.xlu1 %v380_v24  ;;  %vm189_vm1 = vcmask 1041409   ;;  %vm192_vm2 = vcmask 58368   ;;  %vm242_vm3 = vcmask 254976  }
  0x28   :  { %v431_v5 = vld [vmem:[#allocation2] sm:$0xff]  ;;  %v284_v6 = vpack.c.bf16 %v51_v4, %v50_v2  ;;  %v47_v7 = vld [vmem:[#allocation2 + $0x8] sm:$0xff]  ;;  %v154_v9 = vshrl.u32 %v153_v8, 7  ;;  %v180_v31 = vand.u32 127, %v153_v8 }
  0x29   :  { %277 = vmatprep.mubr.msk.f32.mxu0 %vm52_vm0, %v431_v5  ;;  %281 = vmatprep.subr.bf16.mxu0 %v280_v3  ;;  %v151_v10 = vld [vmem:[%s462_s1] sm:$0x3]  ;;  %s381_s1 = smov [#allocation7]  }
  0x2a   :  { %283 = vmatpush3.bf16.msra.mxu0 %v280_v3  ;;  %v155_v11 = vsub.s32 0, %v154_v9  ;;  %v162_v12 = vsub.s32 1, %v154_v9  ;;  %v262_v17 = vld [vmem:[%s464_s3] ss:$0 sm:$0xff]  ;;  %v183_v32 = vsub.s32 %v180_v31, %v154_v9  ;;  %s250_s3 = sshll.u32 %s381_s1, 4  ;;  %s251_s3 = int_to_ptr.vmem [resolvable:$true] %s250_s3 }
  0x2b   :  { %285 = vmatprep.subr.bf16.mxu0 %v284_v6  ;;  %s348_s17 = scalar_lea.vmem %s251_s3, 32  ;;  %p353_p3 = scmp.lt.s32.totalorder %s251_s3, %s251_s3 }
  0x2c   :  { %v156_v13 = vrot.slane %v151_v10, %v155_v11  ;;  %v163_v14 = vrot.slane %v151_v10, %v162_v12  ;;  %p349_p2 = scmp.ne.s32.totalorder %s251_s3, %s348_s17  ;;  %p354_p4 = scmp.lt.s32.totalorder %s348_s17, %s348_s17 }
  0x2e   :  { %287 = vmatpush3.bf16.msra.mxu0 %v284_v6  ;;  %158 = vbcast.lane.b32.xlu1 %v156_v13, 256  ;;  %p355_p5 = por %p354_p4, %p353_p3 }
  0x30   :  { %p356_p6 = pnand %p355_p5, %p349_p2 }
  0x31   :  { %278 = vmatmul.mubr.msk.f32.vlgmr.msra.gmra.mrb[0].mxu0 %vm52_vm0, %v47_v7 }
  0x32   :  { %165 = vbcast.lane.b32.xlu1 %v163_v14, 256 }
  0xa0   :  { %v159_v25 = vpop.permute.xlu1 %158 }
  0xa4   :  { %v166_v28 = vpop.permute.xlu1 %165 }
 0x104   :  { %v279_v15 = vpop.f32.mrb[0].mxu0 }
 0x105   :  { %296 = vtanh.f32 %v279_v15  ;;  %v125_v16 = vpop.f32.mrb[1].mxu0 }
 0x106   :  { %298 = vtanh.f32 %v125_v16 }
 0x10f   :  { %v297_v18 = vpop.eup %296 }
 0x110   :  { %v299_v19 = vpop.eup %298  ;;  %v144_v22 = vmul.f32 %v297_v18, %v262_v17 }
 0x111   :  { %v143_v20 = vmul.f32 %v299_v19, %v262_v17 }
 0x112   :  { %v148_v23 = vsel %vm52_vm0, %v144_v22, 0.0 }
 0x113   :  { %v145_v21 = vsel %vm52_vm0, %v143_v20, 0.0 }
 0x114   :  { %146 = vadd.xlane.f32.xlu0 %v145_v21 }
 0x118   :  { %149 = vadd.xlane.f32.xlu0 %v148_v23 }
 0x1a1   :  { %v147_v26 = vpop.xlane.xlu0 %146 }
 0x1a2   :  { %v169_v27 = vmul.f32 %v159_v25, %v147_v26 }
 0x1a4   :  { %174 = vperm.xlu0 %294, %v169_v27  }
 0x1a5   :  { %v150_v29 = vpop.xlane.xlu0 %149 }
 0x1a6   :  { %v170_v30 = vmul.f32 %v166_v28, %v150_v29 }
 0x1a8   :  { %177 = vperm.xlu1 %295, %v170_v30  }
 0x223   :  { %v175_v33 = vpop.permute.xlu0 %174 }
 0x224   :  { %v184_v35 = vrot.slane %v175_v33, %v183_v32 }
 0x227   :  { %v178_v34 = vpop.permute.xlu1 %177 }
 0x228   :  { %v188_v36 = vrot.slane %v178_v34, %v183_v32 }
 0x22a   :  { %v190_v37 = vsel %vm189_vm1, %v188_v36, %v184_v35 }
 0x22b   :  { %v193_v38 = vsel %vm192_vm2, %v190_v37, 0.0 }
 0x22c   :  { %194 = vadd.xlane.f32.xlu1 %v193_v38 }
 0x2b9   :  { %v195_v39 = vpop.xlane.xlu1 %194 }
 0x2ba   :  { %v196_v40 = vadd.f32 1e-30, %v195_v39 }
 0x2bc   :  { %v201_v41 = vrot.slane %v196_v40, %v155_v11  ;;  %v205_v42 = vrot.slane %v196_v40, %v162_v12 }
 0x2be   :  { %300 = vrcp.f32 %v201_v41 }
 0x2bf   :  { %302 = vrcp.f32 %v205_v42 }
 0x2c8   :  { %v301_v43 = vpop.eup %300 }
 0x2c9   :  { %v303_v44 = vpop.eup %302  ;;  %v209_v45 = vmul.f32 %v301_v43, %v169_v27 }
 0x2ca   :  { %v211_v46 = vmul.f32 %v303_v44, %v170_v30 }
 0x2cb   :  { %214 = vperm.xlu1 %295, %v209_v45  }
 0x2cc   :  { %219 = vperm.xlu0 %294, %v211_v46  }
 0x34a   :  { %v215_v47 = vpop.permute.xlu1 %214 }
 0x34b   :  { %v220_v48 = vpop.permute.xlu0 %219  ;;  %v222_v49 = vmul.f32 %v215_v47, %v431_v5 }
 0x34c   :  { %v223_v50 = vmul.f32 %v220_v48, %v47_v7 }
 0x34d   :  { %v224_v51 = vsel %vm52_vm0, %v222_v49, 0.0 }
 0x34e   :  { %v231_v52 = vsel %vm52_vm0, %v223_v50, 0.0  ;;  %v225_v53 = vrot.slane %v224_v51, 4 }
 0x34f   :  { %v232_v54 = vrot.slane %v231_v52, 4 }
 0x350   :  { %v226_v55 = vadd.f32 %v225_v53, %v224_v51 }
 0x351   :  { %v233_v56 = vadd.f32 %v232_v54, %v231_v52 }
 0x352   :  { %v227_v57 = vrot.slane %v226_v55, 2 }
 0x353   :  { %v234_v58 = vrot.slane %v233_v56, 2 }
 0x354   :  { %v228_v59 = vadd.f32 %v227_v57, %v226_v55 }
 0x355   :  { %v235_v60 = vadd.f32 %v234_v58, %v233_v56 }
 0x356   :  { %v229_v61 = vrot.slane %v228_v59, 1 }
 0x357   :  { %v236_v62 = vrot.slane %v235_v60, 1 }
 0x358   :  { %v230_v63 = vadd.f32 %v229_v61, %v228_v59 }
 0x359   :  { %v237_v0 = vadd.f32 %v236_v62, %v235_v60 }
 0x35b   :  { %v240_v1 = vsel %vm189_vm1, %v237_v0, %v230_v63 }
 0x35c   :  { %243 = vst.msk [vmem:[#allocation7] sm:$0x3] %vm242_vm3, %v240_v1 }
 0x35d   :  { %359 = shalt.err (!%p356_p6)
}
 0x35e   :  { %s360_s20 = scalar_lea.hbm %s465_s4, 32 }
 0x35f   :  { %p361_p7 = scmp.ne.s32.totalorder %s465_s4, %s360_s20  ;;  %p364_p8 = scmp.lt.u32.totalorder %s360_s20, %s465_s4 }
 0x361   :  { %p366_p9 = pnand %p364_p8, %p361_p7 }
 0x363   :  { %369 = shalt.err (!%p366_p9)
}
 0x364   :  { %253 = dma.vmem_to_hbm [thread:$0]  %s251_s3, 32, %s465_s4, [#allocation4]  }
 0x365   :  { %374 = dma.done.wait [#allocation4], 32  }
 0x366   :  { %375 = vsyncadd [#allocation4], 4294967264 }
 0x367   :  { %257 = vsyncpa [#allocation3], 1 }
 0x368   :  { %258 = vsyncpa [#allocation6], 1 }
 0x369   :  { %259 = vsyncpa [#allocation4], 1 }

</bundles_post_ra>
